<compile_context>
chip_gen: v7x
topology: tpu7x:2x2x1
jax: 0.10.0
libtpu: 0.0.40
codegen_flags: <defaults>
</compile_context>

<pallas_src>
import functools

import jax
import jax.numpy as jnp
from jax import lax
from jax.experimental import pallas as pl
from jax.experimental.pallas import tpu as pltpu


def _round_up(v: int, m: int) -> int:
    return (v + m - 1) // m * m


def _pick_tile(dim_padded: int) -> int:
    # dim_padded is always a multiple of 128, so 128 always divides.
    for t in (512, 256, 128):
        if dim_padded % t == 0:
            return t
    return dim_padded


def _make_kernel(*, apply_bn: bool, use_batch_stats: bool, use_dropout: bool,
                 keep_threshold: int, inv_keep: float, eps: float):
    """Builds the kernel for a given static configuration (ref list varies)."""

    def kernel(*refs):
        x_ref, w_ref, b_ref = refs[0], refs[1], refs[2]
        idx = 3
        gamma_ref = beta_ref = rmean_ref = rvar_ref = rbits_ref = None
        if apply_bn:
            gamma_ref, beta_ref = refs[idx], refs[idx + 1]
            idx += 2
            if not use_batch_stats:
                rmean_ref, rvar_ref = refs[idx], refs[idx + 1]
                idx += 2
        if use_dropout:
            rbits_ref = refs[idx]
            idx += 1
        o_ref, acc_ref = refs[idx], refs[idx + 1]

        k = pl.program_id(1)

        @pl.when(k == 0)
        def _init():
            acc_ref[...] = jnp.zeros_like(acc_ref)

        # (N, TK) x (TN, TK) -> (N, TN): contract in_dim of x against in_dim of W
        # (PyTorch weight layout, no transpose copy).  bf16 in, f32 accumulate.
        acc_ref[...] += lax.dot_general(
            x_ref[...], w_ref[...],
            dimension_numbers=(((1,), (1,)), ((), ())),
            preferred_element_type=jnp.float32)

        @pl.when(k == pl.num_programs(1) - 1)
        def _epilogue():
            y = acc_ref[...] + b_ref[...]                     # bias, f32
            if apply_bn:
                if use_batch_stats:
                    # Training-mode BN: batch mean / biased variance per column.
                    mean = jnp.mean(y, axis=0, keepdims=True)   # sublane reduce (XLU)
                    var = jnp.mean((y - mean) ** 2, axis=0, keepdims=True)
                else:
                    mean = rmean_ref[...]
                    var = rvar_ref[...]
                y = (y - mean) * lax.rsqrt(var + eps) * gamma_ref[...] + beta_ref[...]
            y = jnp.maximum(y, 0.0)                           # ReLU
            if use_dropout:
                # Integer-domain keep test: rbits uniform in [0, 2^31).
                keep = rbits_ref[...] < jnp.int32(keep_threshold)
                y = jnp.where(keep, y * inv_keep, 0.0)
            o_ref[...] = y.astype(o_ref.dtype)

    return kernel


def fc_block(x, w, b, gamma=None, beta=None, *, batch_norm: bool = True,
             dropout: float = 0.5, training: bool = True, eps: float = 1e-5,
             rng_key=None, running_mean=None, running_var=None):
    """x: (N, in_dim) f32; w: (out_dim, in_dim) f32 (PyTorch layout);
    b/gamma/beta/running_*: (out_dim,) f32; rng_key: jax PRNG key for dropout."""
    n, in_dim = x.shape
    out_dim, in_dim_w = w.shape
    assert in_dim_w == in_dim

    # Pad feature dims (never the batch dim -> BN batch stats stay exact) to
    # multiples of 128 so all tiles are lane-dense and MXU-friendly.
    in_p = _round_up(in_dim, 128)
    out_p = _round_up(out_dim, 128)
    tk = _pick_tile(in_p)
    tn = _pick_tile(out_p)

    x_p = jnp.pad(x, ((0, 0), (0, in_p - in_dim))).astype(jnp.bfloat16)
    w_p = jnp.pad(w, ((0, out_p - out_dim), (0, in_p - in_dim))).astype(jnp.bfloat16)
    b_p = jnp.pad(b, (0, out_p - out_dim)).reshape(1, out_p).astype(jnp.float32)

    apply_bn = bool(batch_norm)
    use_batch_stats = bool(training)          # PyTorch BN uses batch stats in training
    use_dropout = bool(training) and float(dropout) > 0.0

    inputs = [x_p, w_p, b_p]
    in_specs = [
        pl.BlockSpec((n, tk), lambda j, k: (0, k)),    # x: full batch, K-tile
        pl.BlockSpec((tn, tk), lambda j, k: (j, k)),   # W: (out, in) tile
        pl.BlockSpec((1, tn), lambda j, k: (0, j)),    # bias row
    ]

    row_spec = pl.BlockSpec((1, tn), lambda j, k: (0, j))
    if apply_bn:
        g = gamma if gamma is not None else jnp.ones((out_dim,), jnp.float32)
        bt = beta if beta is not None else jnp.zeros((out_dim,), jnp.float32)
        inputs.append(jnp.pad(g, (0, out_p - out_dim)).reshape(1, out_p).astype(jnp.float32))
        inputs.append(jnp.pad(bt, (0, out_p - out_dim)).reshape(1, out_p).astype(jnp.float32))
        in_specs += [row_spec, row_spec]
        if not use_batch_stats:
            rm = running_mean if running_mean is not None else jnp.zeros((out_dim,), jnp.float32)
            rv = running_var if running_var is not None else jnp.ones((out_dim,), jnp.float32)
            inputs.append(jnp.pad(rm, (0, out_p - out_dim)).reshape(1, out_p).astype(jnp.float32))
            inputs.append(jnp.pad(rv, (0, out_p - out_dim)).reshape(1, out_p).astype(jnp.float32))
            in_specs += [row_spec, row_spec]

    keep_threshold, inv_keep = 0, 1.0
    if use_dropout:
        keep_prob = 1.0 - float(dropout)
        if rng_key is None:
            rng_key = jax.random.PRNGKey(0)
        # Uniform int32 in [0, 2^31); generated once outside the kernel, streamed in
        # tile-by-tile alongside the output block (i.i.d. across feature tiles).
        bits = jax.random.bits(rng_key, (n, out_p), dtype=jnp.uint32)
        rbits = jnp.right_shift(bits, 1).astype(jnp.int32)
        inputs.append(rbits)
        in_specs.append(pl.BlockSpec((n, tn), lambda j, k: (0, j)))
        keep_threshold = min(int(round(keep_prob * (1 << 31))), (1 << 31) - 1)
        inv_keep = 1.0 / keep_prob

    kernel = _make_kernel(
        apply_bn=apply_bn, use_batch_stats=use_batch_stats, use_dropout=use_dropout,
        keep_threshold=keep_threshold, inv_keep=float(inv_keep), eps=float(eps))

    grid_spec = pltpu.PrefetchScalarGridSpec(
        num_scalar_prefetch=0,
        grid=(out_p // tn, in_p // tk),          # feature tiles, then reduction (last)
        in_specs=in_specs,
        out_specs=pl.BlockSpec((n, tn), lambda j, k: (0, j)),
        scratch_shapes=[pltpu.VMEM((n, tn), jnp.float32)],   # f32 accumulator
    )

    out_padded = pl.pallas_call(
        kernel,
        out_shape=jax.ShapeDtypeStruct((n, out_p), x.dtype),
        grid_spec=grid_spec,
        compiler_params=pltpu.CompilerParams(
            dimension_semantics=("parallel", "arbitrary"),
            vmem_limit_bytes=64 * 1024 * 1024,
        ),
    )(*inputs)

    return out_padded[:, :out_dim]


if __name__ == "__main__":
    # Small, deterministic problem: batch=8, in_dim=32, out_dim=32.
    N, IN_DIM, OUT_DIM = 8, 32, 32
    DROPOUT = 0.5
    BATCH_NORM = True

    key = jax.random.PRNGKey(0)
    kx, kw, kb, kd = jax.random.split(key, 4)

    x = jax.random.normal(kx, (N, IN_DIM), dtype=jnp.float32)

    # PyTorch nn.Linear default init: U(-1/sqrt(in_dim), 1/sqrt(in_dim)).
    bound = 1.0 / (IN_DIM ** 0.5)
    w = jax.random.uniform(kw, (OUT_DIM, IN_DIM), jnp.float32, -bound, bound)
    b = jax.random.uniform(kb, (OUT_DIM,), jnp.float32, -bound, bound)

    # BatchNorm1d affine params at PyTorch init: gamma=1, beta=0.
    gamma = jnp.ones((OUT_DIM,), dtype=jnp.float32)
    beta = jnp.zeros((OUT_DIM,), dtype=jnp.float32)

    out = fc_block(x, w, b, gamma, beta,
                   batch_norm=BATCH_NORM, dropout=DROPOUT, training=True,
                   rng_key=kd)
    out = jax.block_until_ready(out)

    assert out.shape == (N, OUT_DIM) and out.dtype == jnp.float32
    assert bool(jnp.all(jnp.isfinite(out)))
    print("KERNEL_OK")
</pallas_src>

<mosaic_0001>
module attributes {stable_mosaic.version = 11 : i64} {
  func.func @kernel(%arg0: i32, %arg1: i32, %arg2: memref<8x128xbf16, #tpu.memory_space<vmem>>, %arg3: memref<128x128xbf16, #tpu.memory_space<vmem>>, %arg4: memref<1x128xf32, #tpu.memory_space<vmem>>, %arg5: memref<1x128xf32, #tpu.memory_space<vmem>>, %arg6: memref<1x128xf32, #tpu.memory_space<vmem>>, %arg7: memref<8x128xi32, #tpu.memory_space<vmem>>, %arg8: memref<8x128xf32, #tpu.memory_space<vmem>>, %arg9: memref<8x128xf32, #tpu.memory_space<vmem>>) attributes {dimension_semantics = [#tpu.dimension_semantics<parallel>, #tpu.dimension_semantics<arbitrary>], iteration_bounds = array<i64: 1, 1>, scalar_prefetch = 0 : i64, scratch_operands = 1 : i64, tpu.core_type = #tpu.core_type<tc>, window_params = [{transform_indices = @transform_0, window_bounds = array<i64: 8, 128>}, {transform_indices = @transform_1, window_bounds = array<i64: 128, 128>}, {transform_indices = @transform_2, window_bounds = array<i64: 1, 128>}, {transform_indices = @transform_3, window_bounds = array<i64: 1, 128>}, {transform_indices = @transform_4, window_bounds = array<i64: 1, 128>}, {transform_indices = @transform_5, window_bounds = array<i64: 8, 128>}, {transform_indices = @transform_6, window_bounds = array<i64: 8, 128>}]} {
    %c0_i32 = arith.constant 0 : i32
    %0 = arith.cmpi eq, %arg1, %c0_i32 : i32
    %1 = arith.extui %0 : i1 to i32
    %c0_i32_0 = arith.constant 0 : i32
    %2 = arith.cmpi ne, %1, %c0_i32_0 : i32
    scf.if %2 {
      %cst_10 = arith.constant 0.000000e+00 : f32
      %12 = vector.broadcast %cst_10 : f32 to vector<8x128xf32>
      %c0_11 = arith.constant 0 : index
      %c0_12 = arith.constant 0 : index
      %13 = vector.load %arg9[%c0_11, %c0_12] : memref<8x128xf32, #tpu.memory_space<vmem>>, vector<8x128xf32>
      tpu.vector_store %arg9[%c0_11, %c0_12], %12 {strides = array<i32>} : memref<8x128xf32, #tpu.memory_space<vmem>>, vector<8x128xf32>,
    } else {
    }
    %c0 = arith.constant 0 : index
    %c0_1 = arith.constant 0 : index
    %3 = vector.load %arg9[%c0, %c0_1] : memref<8x128xf32, #tpu.memory_space<vmem>>, vector<8x128xf32>
    %c0_2 = arith.constant 0 : index
    %c0_3 = arith.constant 0 : index
    %4 = vector.load %arg2[%c0_2, %c0_3] : memref<8x128xbf16, #tpu.memory_space<vmem>>, vector<8x128xbf16>
    %c0_4 = arith.constant 0 : index
    %c0_5 = arith.constant 0 : index
    %5 = vector.load %arg3[%c0_4, %c0_5] : memref<128x128xbf16, #tpu.memory_space<vmem>>, vector<128x128xbf16>
    %cst = arith.constant dense<0.000000e+00> : vector<8x128xf32>
    %6 = tpu.matmul %4, %5, %cst {dimension_numbers = #tpu.dot_dimension_numbers<[1], [1], [0], [0], [0, 0, 1, 0], [], []>} : vector<8x128xbf16>, vector<128x128xbf16>, vector<8x128xf32> -> vector<8x128xf32>
    %7 = arith.addf %3, %6 : vector<8x128xf32>
    %c0_6 = arith.constant 0 : index
    %c0_7 = arith.constant 0 : index
    %8 = vector.load %arg9[%c0_6, %c0_7] : memref<8x128xf32, #tpu.memory_space<vmem>>, vector<8x128xf32>
    tpu.vector_store %arg9[%c0_6, %c0_7], %7 {strides = array<i32>} : memref<8x128xf32, #tpu.memory_space<vmem>>, vector<8x128xf32>,
    %c0_i32_8 = arith.constant 0 : i32
    %9 = arith.cmpi eq, %arg1, %c0_i32_8 : i32
    %10 = arith.extui %9 : i1 to i32
    %c0_i32_9 = arith.constant 0 : i32
    %11 = arith.cmpi ne, %10, %c0_i32_9 : i32
    scf.if %11 {
      %c0_10 = arith.constant 0 : index
      %c0_11 = arith.constant 0 : index
      %12 = vector.load %arg9[%c0_10, %c0_11] : memref<8x128xf32, #tpu.memory_space<vmem>>, vector<8x128xf32>
      %c0_12 = arith.constant 0 : index
      %c0_13 = arith.constant 0 : index
      %13 = vector.load %arg4[%c0_12, %c0_13] : memref<1x128xf32, #tpu.memory_space<vmem>>, vector<1x128xf32>
      %14 = vector.broadcast %13 : vector<1x128xf32> to vector<8x128xf32>
      %15 = arith.addf %12, %14 : vector<8x128xf32>
      %cst_14 = arith.constant dense<0.000000e+00> : vector<128xf32>
      %16 = vector.multi_reduction <add>, %15, %cst_14 [0] : vector<8x128xf32> to vector<128xf32>
      %17 = vector.shape_cast %16 : vector<128xf32> to vector<1x128xf32>
      %cst_15 = arith.constant 8.000000e+00 : f32
      %18 = vector.broadcast %cst_15 : f32 to vector<1x128xf32>
      %19 = arith.divf %17, %18 : vector<1x128xf32>
      %20 = vector.broadcast %19 : vector<1x128xf32> to vector<8x128xf32>
      %21 = arith.subf %15, %20 : vector<8x128xf32>
      %22 = arith.mulf %21, %21 : vector<8x128xf32>
      %cst_16 = arith.constant dense<0.000000e+00> : vector<128xf32>
      %23 = vector.multi_reduction <add>, %22, %cst_16 [0] : vector<8x128xf32> to vector<128xf32>
      %24 = vector.shape_cast %23 : vector<128xf32> to vector<1x128xf32>
      %cst_17 = arith.constant 8.000000e+00 : f32
      %25 = vector.broadcast %cst_17 : f32 to vector<1x128xf32>
      %26 = arith.divf %24, %25 : vector<1x128xf32>
      %27 = vector.broadcast %19 : vector<1x128xf32> to vector<8x128xf32>
      %28 = arith.subf %15, %27 : vector<8x128xf32>
      %cst_18 = arith.constant 9.99999974E-6 : f32
      %29 = vector.broadcast %cst_18 : f32 to vector<1x128xf32>
      %30 = arith.addf %26, %29 : vector<1x128xf32>
      %31 = math.rsqrt %30 : vector<1x128xf32>
      %32 = vector.broadcast %31 : vector<1x128xf32> to vector<8x128xf32>
      %33 = arith.mulf %28, %32 : vector<8x128xf32>
      %c0_19 = arith.constant 0 : index
      %c0_20 = arith.constant 0 : index
      %34 = vector.load %arg5[%c0_19, %c0_20] : memref<1x128xf32, #tpu.memory_space<vmem>>, vector<1x128xf32>
      %35 = vector.broadcast %34 : vector<1x128xf32> to vector<8x128xf32>
      %36 = arith.mulf %33, %35 : vector<8x128xf32>
      %c0_21 = arith.constant 0 : index
      %c0_22 = arith.constant 0 : index
      %37 = vector.load %arg6[%c0_21, %c0_22] : memref<1x128xf32, #tpu.memory_space<vmem>>, vector<1x128xf32>
      %38 = vector.broadcast %37 : vector<1x128xf32> to vector<8x128xf32>
      %39 = arith.addf %36, %38 : vector<8x128xf32>
      %cst_23 = arith.constant 0.000000e+00 : f32
      %40 = vector.broadcast %cst_23 : f32 to vector<8x128xf32>
      %41 = arith.maximumf %39, %40 : vector<8x128xf32>
      %c0_24 = arith.constant 0 : index
      %c0_25 = arith.constant 0 : index
      %42 = vector.load %arg7[%c0_24, %c0_25] : memref<8x128xi32, #tpu.memory_space<vmem>>, vector<8x128xi32>
      %c1073741824_i32 = arith.constant 1073741824 : i32
      %43 = vector.broadcast %c1073741824_i32 : i32 to vector<8x128xi32>
      %44 = arith.cmpi slt, %42, %43 : vector<8x128xi32>
      %cst_26 = arith.constant 2.000000e+00 : f32
      %45 = vector.broadcast %cst_26 : f32 to vector<8x128xf32>
      %46 = arith.mulf %41, %45 : vector<8x128xf32>
      %cst_27 = arith.constant 0.000000e+00 : f32
      %47 = vector.broadcast %cst_27 : f32 to vector<8x128xf32>
      %48 = arith.select %44, %46, %47 : vector<8x128xi1>, vector<8x128xf32>
      %c0_28 = arith.constant 0 : index
      %c0_29 = arith.constant 0 : index
      %49 = vector.load %arg8[%c0_28, %c0_29] : memref<8x128xf32, #tpu.memory_space<vmem>>, vector<8x128xf32>
      tpu.vector_store %arg8[%c0_28, %c0_29], %48 {strides = array<i32>} : memref<8x128xf32, #tpu.memory_space<vmem>>, vector<8x128xf32>,
    } else {
    }
    return
  }
  func.func @transform_0(%arg0: i32, %arg1: i32) -> (i32, i32) {
    %c0_i32 = arith.constant 0 : i32
    %c0_i32_0 = arith.constant 0 : i32
    return %c0_i32, %arg1 : i32, i32
  }
  func.func @transform_1(%arg0: i32, %arg1: i32) -> (i32, i32) {
    %c0_i32 = arith.constant 0 : i32
    return %arg0, %arg1 : i32, i32
  }
  func.func @transform_2(%arg0: i32, %arg1: i32) -> (i32, i32) {
    %c0_i32 = arith.constant 0 : i32
    %c0_i32_0 = arith.constant 0 : i32
    return %c0_i32, %arg0 : i32, i32
  }
  func.func @transform_3(%arg0: i32, %arg1: i32) -> (i32, i32) {
    %c0_i32 = arith.constant 0 : i32
    %c0_i32_0 = arith.constant 0 : i32
    return %c0_i32, %arg0 : i32, i32
  }
  func.func @transform_4(%arg0: i32, %arg1: i32) -> (i32, i32) {
    %c0_i32 = arith.constant 0 : i32
    %c0_i32_0 = arith.constant 0 : i32
    return %c0_i32, %arg0 : i32, i32
  }
  func.func @transform_5(%arg0: i32, %arg1: i32) -> (i32, i32) {
    %c0_i32 = arith.constant 0 : i32
    %c0_i32_0 = arith.constant 0 : i32
    return %c0_i32, %arg0 : i32, i32
  }
  func.func @transform_6(%arg0: i32, %arg1: i32) -> (i32, i32) {
    %c0_i32 = arith.constant 0 : i32
    %c0_i32_0 = arith.constant 0 : i32
    return %c0_i32, %arg0 : i32, i32
  }
}

</mosaic_0001>

<bundles_post_ra>
// kernel: tpu_custom_call.1
= control target key start
LH: loop header
LB: loop body
LE: loop exit
PB: predicated region body
PF: predicated region fallthrough
CT: control target
= control target key end

     0   :  { %11 = vsyncpa [#allocation4], 0  ;;  %s637_s0 = inlined_call_operand.hbm [shape: bf16[8,128], index: 0, kind: input, shape index: {}]   ;;  %s638_s1 = inlined_call_operand.hbm [shape: bf16[128,128], index: 1, kind: input, shape index: {}]   ;;  %s639_s2 = inlined_call_operand.hbm [shape: f32[1,128], index: 2, kind: input, shape index: {}]   ;;  %s640_s3 = inlined_call_operand.hbm [shape: f32[1,128], index: 3, kind: input, shape index: {}]   ;;  %s641_s4 = inlined_call_operand.hbm [shape: f32[1,128], index: 4, kind: input, shape index: {}]   ;;  %s642_s5 = inlined_call_operand.hbm [shape: s32[8,128], index: 5, kind: input, shape index: {}]   ;;  %s643_s6 = inlined_call_operand.hbm [shape: f32[8,128], index: 6, kind: output, shape index: {}]  }
   0x1   :  { %12 = vsyncpa [#allocation7], 0 }
   0x2   :  { %13 = vsyncpa [#allocation10], 0 }
   0x3   :  { %14 = vsyncpa [#allocation13], 0 }
   0x4   :  { %15 = vsyncpa [#allocation5], 0  ;;  %s507_s21 = smov [#allocation6]   ;;  %s343_s25 = scalar_lea.hbm %s638_s1, 1024 }
   0x5   :  { %s31_s22 = sshll.u32 %s507_s21, 4  ;;  %p344_p0 = scmp.ne.s32.totalorder %s638_s1, %s343_s25  ;;  %s32_s22 = int_to_ptr.vmem [resolvable:$true] %s31_s22 }
   0x6   :  { %p347_p1 = scmp.lt.u32.totalorder %s343_s25, %s638_s1 }
   0x8   :  { %p349_p2 = pnand %p347_p1, %p344_p0 }
   0xa   :  { %352 = shalt.err (!%p349_p2)
}
   0xb   :  { %s353_s30 = scalar_lea.vmem %s32_s22, 1024  ;;  %p358_p4 = scmp.lt.s32.totalorder %s32_s22, %s32_s22 }
   0xc   :  { %p354_p3 = scmp.ne.s32.totalorder %s32_s22, %s353_s30  ;;  %p359_p5 = scmp.lt.s32.totalorder %s353_s30, %s353_s30 }
   0xe   :  { %p360_p6 = por %p359_p5, %p358_p4 }
  0x10   :  { %p361_p7 = pnand %p360_p6, %p354_p3 }
  0x12   :  { %364 = shalt.err (!%p361_p7)
}
  0x13   :  { %s508_s7 = smov 64   ;;  %s509_s8 = smov 4  }
  0x14   :  { %37 = dma.hbm_to_vmem [thread:$0]  %s638_s1, 1024, %s32_s22, [#allocation7], %s508_s7, %s508_s7, %s509_s8  }
  0x15   :  { %s510_s11 = smov [#allocation9]   ;;  %s511_s13 = smov [#allocation3]  }
  0x16   :  { %s54_s12 = sshll.u32 %s510_s11, 4  ;;  %s22_s14 = sshll.u32 %s511_s13, 4  ;;  %s55_s12 = int_to_ptr.vmem [resolvable:$true] %s54_s12  ;;  %s23_s14 = int_to_ptr.vmem [resolvable:$true] %s22_s14 }
  0x17   :  { %s365_s17 = scalar_lea.hbm %s640_s3, 16 }
  0x18   :  { %p366_p8 = scmp.ne.s32.totalorder %s640_s3, %s365_s17  ;;  %p369_p9 = scmp.lt.u32.totalorder %s365_s17, %s640_s3 }
  0x1a   :  { %p371_p10 = pnand %p369_p9, %p366_p8 }
  0x1c   :  { %374 = shalt.err (!%p371_p10)
}
  0x1d   :  { %s375_s1 = scalar_lea.vmem %s55_s12, 16  ;;  %s379_s22 = scalar_lea.vmem %s55_s12, 32 }
  0x1e   :  { %p376_p11 = scmp.ne.s32.totalorder %s55_s12, %s375_s1  ;;  %p380_p12 = scmp.lt.s32.totalorder %s55_s12, %s55_s12 }
  0x1f   :  { %p381_p13 = scmp.lt.s32.totalorder %s379_s22, %s375_s1 }
  0x21   :  { %p382_p0 = por %p381_p13, %p380_p12 }
  0x23   :  { %p383_p1 = pnand %p382_p0, %p376_p11 }
  0x25   :  { %386 = shalt.err (!%p383_p1)
}
  0x26   :  { %57 = dma.hbm_to_vmem [thread:$0]  %s640_s3, 16, %s55_s12, [#allocation10]  }
  0x27   :  { %s387_s27 = scalar_lea.hbm %s637_s0, 64 }
  0x28   :  { %p388_p2 = scmp.ne.s32.totalorder %s637_s0, %s387_s27  ;;  %p391_p3 = scmp.lt.u32.totalorder %s387_s27, %s637_s0 }
  0x2a   :  { %p393_p4 = pnand %p391_p3, %p388_p2 }
  0x2c   :  { %396 = shalt.err (!%p393_p4)
}
  0x2d   :  { %s397_s8 = scalar_lea.vmem %s23_s14, 64  ;;  %p402_p6 = scmp.lt.s32.totalorder %s23_s14, %s23_s14 }
  0x2e   :  { %p398_p5 = scmp.ne.s32.totalorder %s23_s14, %s397_s8  ;;  %p403_p7 = scmp.lt.s32.totalorder %s397_s8, %s397_s8 }
  0x30   :  { %p404_p8 = por %p403_p7, %p402_p6 }
  0x32   :  { %p405_p9 = pnand %p404_p8, %p398_p5 }
  0x34   :  { %408 = shalt.err (!%p405_p9)
}
  0x35   :  { %25 = dma.hbm_to_vmem [thread:$0]  %s637_s0, 64, %s23_s14, [#allocation4]  }
  0x36   :  { %s512_s10 = smov [#allocation8]   ;;  %s513_s12 = smov [#allocation11]  }
  0x37   :  { %s44_s11 = sshll.u32 %s512_s10, 4  ;;  %s64_s13 = sshll.u32 %s513_s12, 4  ;;  %s45_s11 = int_to_ptr.vmem [resolvable:$true] %s44_s11  ;;  %s65_s13 = int_to_ptr.vmem [resolvable:$true] %s64_s13 }
  0x38   :  { %s409_s17 = scalar_lea.hbm %s639_s2, 16 }
  0x39   :  { %p410_p10 = scmp.ne.s32.totalorder %s639_s2, %s409_s17  ;;  %p413_p11 = scmp.lt.u32.totalorder %s409_s17, %s639_s2 }
  0x3b   :  { %p415_p12 = pnand %p413_p11, %p410_p10 }
  0x3d   :  { %418 = shalt.err (!%p415_p12)
}
  0x3e   :  { %s419_s0 = scalar_lea.vmem %s45_s11, 16  ;;  %s423_s14 = scalar_lea.vmem %s45_s11, 32 }
  0x3f   :  { %p420_p13 = scmp.ne.s32.totalorder %s45_s11, %s419_s0  ;;  %p424_p0 = scmp.lt.s32.totalorder %s45_s11, %s45_s11 }
  0x40   :  { %p425_p1 = scmp.lt.s32.totalorder %s423_s14, %s419_s0 }
  0x42   :  { %p426_p2 = por %p425_p1, %p424_p0 }
  0x44   :  { %p427_p3 = pnand %p426_p2, %p420_p13 }
  0x46   :  { %430 = shalt.err (!%p427_p3)
}
  0x47   :  { %47 = dma.hbm_to_vmem [thread:$0]  %s639_s2, 16, %s45_s11, [#allocation7]  }
  0x48   :  { %s431_s25 = scalar_lea.hbm %s641_s4, 16 }
  0x49   :  { %p432_p4 = scmp.ne.s32.totalorder %s641_s4, %s431_s25  ;;  %p435_p5 = scmp.lt.u32.totalorder %s431_s25, %s641_s4 }
  0x4b   :  { %p437_p6 = pnand %p435_p5, %p432_p4 }
  0x4d   :  { %440 = shalt.err (!%p437_p6)
}
  0x4e   :  { %s441_s30 = scalar_lea.vmem %s65_s13, 16  ;;  %s445_s7 = scalar_lea.vmem %s65_s13, 32 }
  0x4f   :  { %p442_p7 = scmp.ne.s32.totalorder %s65_s13, %s441_s30  ;;  %p446_p8 = scmp.lt.s32.totalorder %s65_s13, %s65_s13 }
  0x50   :  { %p447_p9 = scmp.lt.s32.totalorder %s445_s7, %s441_s30 }
  0x52   :  { %p448_p10 = por %p447_p9, %p446_p8 }
  0x54   :  { %p449_p11 = pnand %p448_p10, %p442_p7 }
  0x56   :  { %452 = shalt.err (!%p449_p11)
}
  0x57   :  { %67 = dma.hbm_to_vmem [thread:$0]  %s641_s4, 16, %s65_s13, [#allocation10]  }
  0x58   :  { %s514_s3 = smov [#allocation12]   ;;  %s453_s12 = scalar_lea.hbm %s642_s5, 128 }
  0x59   :  { %s74_s9 = sshll.u32 %s514_s3, 4  ;;  %p454_p12 = scmp.ne.s32.totalorder %s642_s5, %s453_s12  ;;  %s75_s9 = int_to_ptr.vmem [resolvable:$true] %s74_s9 }
  0x5a   :  { %p457_p13 = scmp.lt.u32.totalorder %s453_s12, %s642_s5 }
  0x5c   :  { %p459_p0 = pnand %p457_p13, %p454_p12 }
  0x5e   :  { %462 = shalt.err (!%p459_p0)
}
  0x5f   :  { %s463_s19 = scalar_lea.vmem %s75_s9, 128  ;;  %p468_p2 = scmp.lt.s32.totalorder %s75_s9, %s75_s9 }
  0x60   :  { %p464_p1 = scmp.ne.s32.totalorder %s75_s9, %s463_s19  ;;  %p469_p3 = scmp.lt.s32.totalorder %s463_s19, %s463_s19 }
  0x62   :  { %p470_p4 = por %p469_p3, %p468_p2 }
  0x64   :  { %p471_p5 = pnand %p470_p4, %p464_p1 }
  0x66   :  { %474 = shalt.err (!%p471_p5)
}
  0x67   :  { %77 = dma.hbm_to_vmem [thread:$0]  %s642_s5, 128, %s75_s9, [#allocation13]  }
  0x68   :  { %497 = dma.done.wait [#allocation4], 64  }
  0x69   :  { %498 = vsyncadd [#allocation4], 4294967232 }
  0x6a   :  { %499 = dma.done.wait [#allocation7], 1040  }
  0x6b   :  { %500 = vsyncadd [#allocation7], 4294966256 }
  0x6c   :  { %501 = dma.done.wait [#allocation10], 32  }
  0x6d   :  { %502 = vsyncadd [#allocation10], 4294967264 }
  0x6e   :  { %503 = dma.done.wait [#allocation13], 128  }
  0x6f   :  { %504 = vsyncadd [#allocation13], 4294967168  ;;  %v515_v0 = vmov 0.0   ;;  %vm516_vm0 = vmmov 0   ;;  %v333_v1 = vld [vmem:[#allocation6] sm:$0xff]   ;;  %v334_v2 = vld [vmem:[#allocation6 + $0x8] sm:$0xff]  }
  0x70   :  { %302 = vmatprep.subr.bf16.mxu0 %v515_v0  ;;  %318 = vmatprep.mubr.msk.bf16.mxu0 %vm516_vm0, %v515_v0  ;;  %v335_v3 = vld [vmem:[#allocation6 + $0x10] sm:$0xff]   ;;  %v336_v4 = vld [vmem:[#allocation6 + $0x18] sm:$0xff]   ;;  %v337_v5 = vld [vmem:[#allocation6 + $0x20] sm:$0xff]   ;;  %s517_s5 = smov [#allocation14]  }
  0x71   :  { %303 = vmatpush3.bf16.xpose.msra.mxu0 %v333_v1  ;;  %v338_v6 = vld [vmem:[#allocation6 + $0x28] sm:$0xff]   ;;  %v339_v7 = vld [vmem:[#allocation6 + $0x30] sm:$0xff]   ;;  %v340_v8 = vld [vmem:[#allocation6 + $0x38] sm:$0xff]   ;;  %s270_s20 = sshll.u32 %s517_s5, 4  ;;  %s271_s20 = int_to_ptr.vmem [resolvable:$true] %s270_s20 }
  0x72   :  { %304 = vmatprep.subr.bf16.mxu0 %v515_v0  ;;  %v103_v9 = vld [vmem:[#allocation3] sm:$0xf]  ;;  %v290_v10 = vld [vmem:[#allocation8] ss:$0 sm:$0xff]  ;;  %v291_v34 = vld [vmem:[#allocation9] ss:$0 sm:$0xff]  ;;  %p480_p7 = scmp.lt.s32.totalorder %s271_s20, %s271_s20 }
  0x73   :  { %v292_v36 = vld [vmem:[#allocation11] ss:$0 sm:$0xff]  ;;  %v259_v39 = vld [vmem:[#allocation12] sm:$0xff]  ;;  %s475_s21 = scalar_lea.vmem %s271_s20, 128 }
  0x74   :  { %vm260_vm1 = vcmp.lt.s32.totalorder %v259_v39, 1073741824  ;;  %p476_p6 = scmp.ne.s32.totalorder %s271_s20, %s475_s21  ;;  %p481_p8 = scmp.lt.s32.totalorder %s475_s21, %s475_s21 }
  0x76   :  { %p482_p9 = por %p481_p8, %p480_p7 }
  0x78   :  { %p483_p10 = pnand %p482_p9, %p476_p6 }
  0x79   :  { %305 = vmatpush3.bf16.xpose.msra.mxu0 %v334_v2 }
  0x7a   :  { %306 = vmatprep.subr.bf16.mxu0 %v515_v0 }
  0x81   :  { %307 = vmatpush3.bf16.xpose.msra.mxu0 %v335_v3 }
  0x82   :  { %308 = vmatprep.subr.bf16.mxu0 %v515_v0 }
  0x89   :  { %309 = vmatpush3.bf16.xpose.msra.mxu0 %v336_v4 }
  0x8a   :  { %310 = vmatprep.subr.bf16.mxu0 %v515_v0 }
  0x91   :  { %311 = vmatpush3.bf16.xpose.msra.mxu0 %v337_v5 }
  0x92   :  { %312 = vmatprep.subr.bf16.mxu0 %v515_v0 }
  0x99   :  { %313 = vmatpush3.bf16.xpose.msra.mxu0 %v338_v6 }
  0x9a   :  { %314 = vmatprep.subr.bf16.mxu0 %v515_v0 }
  0xa1   :  { %315 = vmatpush3.bf16.xpose.msra.mxu0 %v339_v7 }
  0xa2   :  { %316 = vmatprep.subr.bf16.mxu0 %v515_v0 }
  0xa9   :  { %317 = vmatpush3.bf16.xpose.msra.mxu0 %v340_v8 }
  0xb0   :  { %319 = vmatmul.mubr.bf16.vlgmr.msra.gmra.mrb[0].mxu0 %v103_v9 }
 0x183   :  { %v202_v11 = vpop.f32.mrb[0].mxu0 }
 0x184   :  { %v221_v12 = vadd.f32 %v290_v10, %v202_v11  ;;  %v320_v13 = vpop.f32.mrb[1].mxu0 }
 0x185   :  { %v205_v14 = vpop.f32.mrb[2].mxu0 }
 0x186   :  { %v222_v15 = vrot.slane %v221_v12, 4  ;;  %v321_v16 = vpop.f32.mrb[3].mxu0 }
 0x188   :  { %v223_v17 = vadd.f32 %v222_v15, %v221_v12 }
 0x18a   :  { %v224_v18 = vrot.slane %v223_v17, 2 }
 0x18c   :  { %v225_v19 = vadd.f32 %v224_v18, %v223_v17 }
 0x18e   :  { %v226_v20 = vrot.slane %v225_v19, 1 }
 0x190   :  { %v227_v21 = vadd.f32 %v226_v20, %v225_v19 }
 0x192   :  { %v229_v22 = vmul.f32 0.125, %v227_v21 }
 0x194   :  { %v230_v23 = vsub.f32 %v221_v12, %v229_v22 }
 0x196   :  { %v231_v24 = vmul.f32 %v230_v23, %v230_v23 }
 0x198   :  { %v232_v25 = vrot.slane %v231_v24, 4 }
 0x19a   :  { %v233_v26 = vadd.f32 %v232_v25, %v231_v24 }
 0x19c   :  { %v234_v27 = vrot.slane %v233_v26, 2 }
 0x19e   :  { %v235_v28 = vadd.f32 %v234_v27, %v233_v26 }
 0x1a0   :  { %v236_v29 = vrot.slane %v235_v28, 1 }
 0x1a2   :  { %v237_v30 = vadd.f32 %v236_v29, %v235_v28 }
 0x1a4   :  { %v238_v31 = vmul.f32 0.125, %v237_v30 }
 0x1a6   :  { %v239_v32 = vadd.f32 1e-05, %v238_v31 }
 0x1a8   :  { %341 = vrsqrt.f32 %v239_v32 }
 0x1b2   :  { %v342_v33 = vpop.eup %341 }
 0x1b3   :  { %v241_v35 = vmul.f32 %v342_v33, %v230_v23 }
 0x1b5   :  { %v249_v37 = vmul.f32 %v291_v34, %v241_v35 }
 0x1b7   :  { %v257_v38 = vadd.f32 %v292_v36, %v249_v37 }
 0x1b9   :  { %v258_v40 = vmax.f32 %v257_v38, 0.0 }
 0x1bb   :  { %v261_v41 = vmul.f32 2.0, %v258_v40 }
 0x1bd   :  { %v262_v42 = vsel %vm260_vm1, %v261_v41, 0.0 }
 0x1be   :  { %263 = vst [vmem:[#allocation14] sm:$0xff] %v262_v42 }
 0x1bf   :  { %486 = shalt.err (!%p483_p10)
}
 0x1c0   :  { %s487_s1 = scalar_lea.hbm %s643_s6, 128 }
 0x1c1   :  { %p488_p11 = scmp.ne.s32.totalorder %s643_s6, %s487_s1  ;;  %p491_p12 = scmp.lt.u32.totalorder %s487_s1, %s643_s6 }
 0x1c3   :  { %p493_p13 = pnand %p491_p12, %p488_p11 }
 0x1c5   :  { %496 = shalt.err (!%p493_p13)
}
 0x1c6   :  { %273 = dma.vmem_to_hbm [thread:$0]  %s271_s20, 128, %s643_s6, [#allocation5]  }
 0x1c7   :  { %505 = dma.done.wait [#allocation5], 128  }
 0x1c8   :  { %506 = vsyncadd [#allocation5], 4294967168 }
 0x1c9   :  { %277 = vsyncpa [#allocation4], 1 }
 0x1ca   :  { %278 = vsyncpa [#allocation7], 1 }
 0x1cb   :  { %279 = vsyncpa [#allocation10], 1 }
 0x1cc   :  { %280 = vsyncpa [#allocation13], 1 }
 0x1cd   :  { %281 = vsyncpa [#allocation5], 1 }

</bundles_post_ra>
